<compile_context>
chip_gen: v7x
topology: tpu7x:2x2x1
jax: 0.10.0
libtpu: 0.0.40
codegen_flags: <defaults>
</compile_context>

<pallas_src>
import jax
import jax.numpy as jnp
from jax.experimental import pallas as pl
from jax.experimental.pallas import tpu as pltpu

BN_EPS = 1e-5
NUM_EXPERTS = 4


def _moe_mlp_kernel(x_ref, wf_ref, ab_ref, w2_ref, b2_ref, out_ref):
    NE = NUM_EXPERTS
    H = w2_ref.shape[0]          # 4*D1
    N4 = w2_ref.shape[1]         # 4*D2
    D2 = out_ref.shape[1]

    x = x_ref[...].astype(jnp.bfloat16)                      # (B, D0)

    # ---- one wide first-stage matmul: [expert pre-acts | attention logits] --
    h_all = jnp.dot(x, wf_ref[...], preferred_element_type=jnp.float32)  # (B, 4*D1+4)
    h = h_all[:, :H]                                         # (B, 4*D1)  (b1 dropped: dead under BN)
    logits = h_all[:, H:] + ab_ref[...]                      # (B, 4)

    # ---- softmax over the 4 experts ----------------------------------------
    m = jnp.max(logits, axis=1, keepdims=True)
    e = jnp.exp(logits - m)
    att = e * pl.reciprocal(jnp.sum(e, axis=1, keepdims=True), approx=True)  # (B, 4)

    # ---- BatchNorm1d (train-mode batch stats, gamma=1, beta=0) + ReLU ------
    # One pass over the whole concatenated block: var = E[h^2] - mean^2.
    mean = jnp.mean(h, axis=0, keepdims=True)                # (1, 4*D1)
    var = jnp.mean(h * h, axis=0, keepdims=True) - mean * mean
    h = jnp.maximum((h - mean) * jax.lax.rsqrt(var + BN_EPS), 0.0)

    # ---- second layer: all 4 experts at once via block-diagonal W2 ---------
    o = jnp.dot(h.astype(jnp.bfloat16), w2_ref[...],
                preferred_element_type=jnp.float32) + b2_ref[...]
    o = jnp.maximum(o, 0.0)                                  # (B, 4*D2)

    # ---- attention-weighted combine: out[b,d] = sum_k att[b,k]*o[b,k*D2+d] --
    # expand[k, j] = 1 iff column j belongs to expert k's block
    row_k = jax.lax.broadcasted_iota(jnp.int32, (NE, N4), 0)
    col_j = jax.lax.broadcasted_iota(jnp.int32, (NE, N4), 1)
    expand = jnp.where((col_j >= row_k * D2) & (col_j < (row_k + 1) * D2),
                       1.0, 0.0).astype(jnp.bfloat16)        # (4, 4*D2)
    att_exp = jnp.dot(att.astype(jnp.bfloat16), expand,
                      preferred_element_type=jnp.float32)    # (B, 4*D2)

    # fold[j, d] = 1 iff j == d (mod D2)  -> sums the 4 expert blocks
    row_j = jax.lax.broadcasted_iota(jnp.int32, (N4, D2), 0)
    col_d = jax.lax.broadcasted_iota(jnp.int32, (N4, D2), 1)
    diff = row_j - col_d
    hit = diff == 0
    for k in range(1, NE):
        hit = hit | (diff == k * D2)
    fold = jnp.where(hit, 1.0, 0.0).astype(jnp.bfloat16)     # (4*D2, D2)

    out_ref[...] = jnp.dot((att_exp * o).astype(jnp.bfloat16), fold,
                           preferred_element_type=jnp.float32)


@jax.jit
def moe_mlp_forward(x, packed):
    """packed = (w_first, att_b, w2_blockdiag, b2_cat) from pack_params()."""
    w_first, att_b, w2_bd, b2_cat = packed
    B = x.shape[0]
    D2 = b2_cat.shape[1] // NUM_EXPERTS
    vmem = pltpu.MemorySpace.VMEM
    return pl.pallas_call(
        _moe_mlp_kernel,
        out_shape=jax.ShapeDtypeStruct((B, D2), jnp.float32),
        in_specs=[pl.BlockSpec(memory_space=vmem)] * 5,
        out_specs=pl.BlockSpec(memory_space=vmem),
    )(x, w_first, att_b, w2_bd, b2_cat)


def init_params(key, layer_sizes):
    """Torch-style (unpacked) params mirroring the module's init:
    weights ~ N(0, 0.01), biases ~ U(-0.1, 0.1). BN gamma/beta left at 1/0."""
    D0, D1, D2 = layer_sizes
    keys = jax.random.split(key, 2 + 4 * 4)
    k = iter(keys)
    att_w = 0.01 * jax.random.normal(next(k), (D0, 4), jnp.float32)
    att_b = jax.random.uniform(next(k), (1, 4), jnp.float32, -0.1, 0.1)
    params = [att_w, att_b]
    for _ in range(4):  # nets 1..4
        w1 = 0.01 * jax.random.normal(next(k), (D0, D1), jnp.float32)
        b1 = jax.random.uniform(next(k), (1, D1), jnp.float32, -0.1, 0.1)
        w2 = 0.01 * jax.random.normal(next(k), (D1, D2), jnp.float32)
        b2 = jax.random.uniform(next(k), (1, D2), jnp.float32, -0.1, 0.1)
        params += [w1, b1, w2, b2]
    return tuple(params)


def pack_params(params):
    """One-time packing: fuse/stack expert + attention weights for the kernel.
    b1 is intentionally discarded (mathematically dead under train-mode BN)."""
    att_w, att_b = params[0], params[1]
    w1s, w2s, b2s = [], [], []
    for i in range(4):
        w1, _b1, w2, b2 = params[2 + 4 * i: 2 + 4 * (i + 1)]
        w1s.append(w1)
        w2s.append(w2)
        b2s.append(b2)
    D1 = w1s[0].shape[1]
    D2 = w2s[0].shape[1]
    # experts first, attention last -> both in-kernel slices are lane aligned.
    w_first = jnp.concatenate(w1s + [att_w], axis=1).astype(jnp.bfloat16)  # (D0, 4*D1+4)
    w2_bd = jnp.zeros((4 * D1, 4 * D2), jnp.float32)
    for k in range(4):
        w2_bd = w2_bd.at[k * D1:(k + 1) * D1, k * D2:(k + 1) * D2].set(w2s[k])
    w2_bd = w2_bd.astype(jnp.bfloat16)                                     # (4*D1, 4*D2)
    b2_cat = jnp.concatenate(b2s, axis=1).astype(jnp.float32)              # (1, 4*D2)
    return (w_first, att_b.astype(jnp.float32), w2_bd, b2_cat)


def reference_forward(x, params):
    """Pure-JAX f32 reference matching the torch module's forward (BN train mode)."""
    att_w, att_b = params[0], params[1]
    att = jax.nn.softmax(x @ att_w + att_b, axis=1)
    outs = []
    for i in range(4):
        w1, b1, w2, b2 = params[2 + 4 * i: 2 + 4 * (i + 1)]
        h = x @ w1 + b1
        mean = jnp.mean(h, axis=0, keepdims=True)
        var = jnp.mean((h - mean) ** 2, axis=0, keepdims=True)
        h = jnp.maximum((h - mean) / jnp.sqrt(var + BN_EPS), 0.0)
        outs.append(jnp.maximum(h @ w2 + b2, 0.0))
    return sum(att[:, i:i + 1] * outs[i] for i in range(4))


if __name__ == "__main__":
    layer_sizes = (32, 64, 8)   # [D0, D1, D2]
    B = 8

    key = jax.random.PRNGKey(0)
    kx, kp = jax.random.split(key)
    x = jax.random.normal(kx, (B, layer_sizes[0]), jnp.float32)
    params = init_params(kp, layer_sizes)
    packed = pack_params(params)

    out = moe_mlp_forward(x, packed)
    out = jax.block_until_ready(out)

    ref = reference_forward(x, params)
    assert out.shape == (B, layer_sizes[-1])
    # bf16 matmul operands (f32 accumulate) -> tolerance relaxed per review.
    assert jnp.allclose(out, ref, atol=1e-2, rtol=1e-2), "mismatch vs reference"
    print("KERNEL_OK")
</pallas_src>

<mosaic_0001>
module attributes {stable_mosaic.version = 11 : i64} {
  func.func @_moe_mlp_kernel(%arg0: memref<8x32xf32, #tpu.memory_space<vmem>>, %arg1: memref<32x260xbf16, #tpu.memory_space<vmem>>, %arg2: memref<1x4xf32, #tpu.memory_space<vmem>>, %arg3: memref<256x32xbf16, #tpu.memory_space<vmem>>, %arg4: memref<1x32xf32, #tpu.memory_space<vmem>>, %arg5: memref<8x8xf32, #tpu.memory_space<vmem>>) attributes {dimension_semantics = [], scalar_prefetch = 0 : i64, scratch_operands = 0 : i64, tpu.core_type = #tpu.core_type<tc>} {
    %c0 = arith.constant 0 : index
    %c0_0 = arith.constant 0 : index
    %0 = vector.load %arg0[%c0, %c0_0] : memref<8x32xf32, #tpu.memory_space<vmem>>, vector<8x32xf32>
    %1 = arith.truncf %0 : vector<8x32xf32> to vector<8x32xbf16>
    %c0_1 = arith.constant 0 : index
    %c0_2 = arith.constant 0 : index
    %2 = vector.load %arg1[%c0_1, %c0_2] : memref<32x260xbf16, #tpu.memory_space<vmem>>, vector<32x260xbf16>
    %cst = arith.constant dense<0.000000e+00> : vector<8x260xf32>
    %3 = tpu.matmul %1, %2, %cst {dimension_numbers = #tpu.dot_dimension_numbers<[1], [0], [0], [1], [0, 0, 1, 1], [], []>} : vector<8x32xbf16>, vector<32x260xbf16>, vector<8x260xf32> -> vector<8x260xf32>
    %4 = vector.extract_strided_slice %3 {offsets = [0, 0], sizes = [8, 256], strides = [1, 1]} : vector<8x260xf32> to vector<8x256xf32>
    %5 = vector.extract_strided_slice %3 {offsets = [0, 256], sizes = [8, 4], strides = [1, 1]} : vector<8x260xf32> to vector<8x4xf32>
    %c0_3 = arith.constant 0 : index
    %c0_4 = arith.constant 0 : index
    %6 = vector.load %arg2[%c0_3, %c0_4] : memref<1x4xf32, #tpu.memory_space<vmem>>, vector<1x4xf32>
    %7 = vector.broadcast %6 : vector<1x4xf32> to vector<8x4xf32>
    %8 = arith.addf %5, %7 : vector<8x4xf32>
    %cst_5 = arith.constant dense<0xFF800000> : vector<8xf32>
    %9 = vector.multi_reduction <maximumf>, %8, %cst_5 [1] : vector<8x4xf32> to vector<8xf32>
    %10 = vector.shape_cast %9 : vector<8xf32> to vector<8x1xf32>
    %11 = vector.broadcast %10 : vector<8x1xf32> to vector<8x4xf32>
    %12 = arith.subf %8, %11 : vector<8x4xf32>
    %13 = math.exp %12 : vector<8x4xf32>
    %cst_6 = arith.constant dense<0.000000e+00> : vector<8xf32>
    %14 = vector.multi_reduction <add>, %13, %cst_6 [1] : vector<8x4xf32> to vector<8xf32>
    %15 = vector.shape_cast %14 : vector<8xf32> to vector<8x1xf32>
    %16 = tpu.reciprocal %15 {approx = true} : vector<8x1xf32> -> vector<8x1xf32>
    %17 = vector.broadcast %16 : vector<8x1xf32> to vector<8x4xf32>
    %18 = arith.mulf %13, %17 : vector<8x4xf32>
    %cst_7 = arith.constant dense<0.000000e+00> : vector<256xf32>
    %19 = vector.multi_reduction <add>, %4, %cst_7 [0] : vector<8x256xf32> to vector<256xf32>
    %20 = vector.shape_cast %19 : vector<256xf32> to vector<1x256xf32>
    %cst_8 = arith.constant 8.000000e+00 : f32
    %21 = vector.broadcast %cst_8 : f32 to vector<1x256xf32>
    %22 = arith.divf %20, %21 : vector<1x256xf32>
    %23 = arith.mulf %4, %4 : vector<8x256xf32>
    %cst_9 = arith.constant dense<0.000000e+00> : vector<256xf32>
    %24 = vector.multi_reduction <add>, %23, %cst_9 [0] : vector<8x256xf32> to vector<256xf32>
    %25 = vector.shape_cast %24 : vector<256xf32> to vector<1x256xf32>
    %cst_10 = arith.constant 8.000000e+00 : f32
    %26 = vector.broadcast %cst_10 : f32 to vector<1x256xf32>
    %27 = arith.divf %25, %26 : vector<1x256xf32>
    %28 = arith.mulf %22, %22 : vector<1x256xf32>
    %29 = arith.subf %27, %28 : vector<1x256xf32>
    %30 = vector.broadcast %22 : vector<1x256xf32> to vector<8x256xf32>
    %31 = arith.subf %4, %30 : vector<8x256xf32>
    %cst_11 = arith.constant 9.99999974E-6 : f32
    %32 = vector.broadcast %cst_11 : f32 to vector<1x256xf32>
    %33 = arith.addf %29, %32 : vector<1x256xf32>
    %34 = math.rsqrt %33 : vector<1x256xf32>
    %35 = vector.broadcast %34 : vector<1x256xf32> to vector<8x256xf32>
    %36 = arith.mulf %31, %35 : vector<8x256xf32>
    %cst_12 = arith.constant 0.000000e+00 : f32
    %37 = vector.broadcast %cst_12 : f32 to vector<8x256xf32>
    %38 = arith.maximumf %36, %37 : vector<8x256xf32>
    %39 = arith.truncf %38 : vector<8x256xf32> to vector<8x256xbf16>
    %c0_13 = arith.constant 0 : index
    %c0_14 = arith.constant 0 : index
    %40 = vector.load %arg3[%c0_13, %c0_14] : memref<256x32xbf16, #tpu.memory_space<vmem>>, vector<256x32xbf16>
    %cst_15 = arith.constant dense<0.000000e+00> : vector<8x32xf32>
    %41 = tpu.matmul %39, %40, %cst_15 {dimension_numbers = #tpu.dot_dimension_numbers<[1], [0], [0], [1], [0, 0, 1, 1], [], []>} : vector<8x256xbf16>, vector<256x32xbf16>, vector<8x32xf32> -> vector<8x32xf32>
    %c0_16 = arith.constant 0 : index
    %c0_17 = arith.constant 0 : index
    %42 = vector.load %arg4[%c0_16, %c0_17] : memref<1x32xf32, #tpu.memory_space<vmem>>, vector<1x32xf32>
    %43 = vector.broadcast %42 : vector<1x32xf32> to vector<8x32xf32>
    %44 = arith.addf %41, %43 : vector<8x32xf32>
    %cst_18 = arith.constant 0.000000e+00 : f32
    %45 = vector.broadcast %cst_18 : f32 to vector<8x32xf32>
    %46 = arith.maximumf %44, %45 : vector<8x32xf32>
    %47 = tpu.iota {dimensions = array<i32: 0>} : vector<4x32xi32>
    %48 = tpu.iota {dimensions = array<i32: 1>} : vector<4x32xi32>
    %c8_i32 = arith.constant 8 : i32
    %49 = vector.broadcast %c8_i32 : i32 to vector<4x32xi32>
    %50 = arith.muli %47, %49 : vector<4x32xi32>
    %51 = arith.cmpi sge, %48, %50 : vector<4x32xi32>
    %c1_i32 = arith.constant 1 : i32
    %52 = vector.broadcast %c1_i32 : i32 to vector<4x32xi32>
    %53 = arith.addi %47, %52 : vector<4x32xi32>
    %c8_i32_19 = arith.constant 8 : i32
    %54 = vector.broadcast %c8_i32_19 : i32 to vector<4x32xi32>
    %55 = arith.muli %53, %54 : vector<4x32xi32>
    %56 = arith.cmpi slt, %48, %55 : vector<4x32xi32>
    %57 = arith.andi %51, %56 : vector<4x32xi1>
    %cst_20 = arith.constant 1.000000e+00 : f32
    %cst_21 = arith.constant 0.000000e+00 : f32
    %58 = vector.broadcast %cst_20 : f32 to vector<4x32xf32>
    %59 = vector.broadcast %cst_21 : f32 to vector<4x32xf32>
    %60 = arith.select %57, %58, %59 : vector<4x32xi1>, vector<4x32xf32>
    %61 = arith.truncf %60 : vector<4x32xf32> to vector<4x32xbf16>
    %62 = arith.truncf %18 : vector<8x4xf32> to vector<8x4xbf16>
    %cst_22 = arith.constant dense<0.000000e+00> : vector<8x32xf32>
    %63 = tpu.matmul %62, %61, %cst_22 {dimension_numbers = #tpu.dot_dimension_numbers<[1], [0], [0], [1], [0, 0, 1, 1], [], []>} : vector<8x4xbf16>, vector<4x32xbf16>, vector<8x32xf32> -> vector<8x32xf32>
    %64 = tpu.iota {dimensions = array<i32: 0>} : vector<32x8xi32>
    %65 = tpu.iota {dimensions = array<i32: 1>} : vector<32x8xi32>
    %66 = arith.subi %64, %65 : vector<32x8xi32>
    %c0_i32 = arith.constant 0 : i32
    %67 = vector.broadcast %c0_i32 : i32 to vector<32x8xi32>
    %68 = arith.cmpi eq, %66, %67 : vector<32x8xi32>
    %c8_i32_23 = arith.constant 8 : i32
    %69 = vector.broadcast %c8_i32_23 : i32 to vector<32x8xi32>
    %70 = arith.cmpi eq, %66, %69 : vector<32x8xi32>
    %71 = arith.ori %68, %70 : vector<32x8xi1>
    %c16_i32 = arith.constant 16 : i32
    %72 = vector.broadcast %c16_i32 : i32 to vector<32x8xi32>
    %73 = arith.cmpi eq, %66, %72 : vector<32x8xi32>
    %74 = arith.ori %71, %73 : vector<32x8xi1>
    %c24_i32 = arith.constant 24 : i32
    %75 = vector.broadcast %c24_i32 : i32 to vector<32x8xi32>
    %76 = arith.cmpi eq, %66, %75 : vector<32x8xi32>
    %77 = arith.ori %74, %76 : vector<32x8xi1>
    %cst_24 = arith.constant 1.000000e+00 : f32
    %cst_25 = arith.constant 0.000000e+00 : f32
    %78 = vector.broadcast %cst_24 : f32 to vector<32x8xf32>
    %79 = vector.broadcast %cst_25 : f32 to vector<32x8xf32>
    %80 = arith.select %77, %78, %79 : vector<32x8xi1>, vector<32x8xf32>
    %81 = arith.truncf %80 : vector<32x8xf32> to vector<32x8xbf16>
    %82 = arith.mulf %63, %46 : vector<8x32xf32>
    %83 = arith.truncf %82 : vector<8x32xf32> to vector<8x32xbf16>
    %cst_26 = arith.constant dense<0.000000e+00> : vector<8x8xf32>
    %84 = tpu.matmul %83, %81, %cst_26 {dimension_numbers = #tpu.dot_dimension_numbers<[1], [0], [0], [1], [0, 0, 1, 1], [], []>} : vector<8x32xbf16>, vector<32x8xbf16>, vector<8x8xf32> -> vector<8x8xf32>
    %c0_27 = arith.constant 0 : index
    %c0_28 = arith.constant 0 : index
    %85 = vector.load %arg5[%c0_27, %c0_28] : memref<8x8xf32, #tpu.memory_space<vmem>>, vector<8x8xf32>
    tpu.vector_store %arg5[%c0_27, %c0_28], %84 {strides = array<i32>} : memref<8x8xf32, #tpu.memory_space<vmem>>, vector<8x8xf32>,
    return
  }
}

</mosaic_0001>

<bundles_post_ra>
// kernel: moe_mlp_forward.1
= control target key start
LH: loop header
LB: loop body
LE: loop exit
PB: predicated region body
PF: predicated region fallthrough
CT: control target
= control target key end

     0   :  { %v699_v2 = vmov 0   ;;  %vm64_vm0 = vcmask 261120   ;;  %v700_v8 = vmov 0.0   ;;  %vm701_vm1 = vmmov 0   ;;  %s839_s0 = inlined_call_operand.vmem [shape: f32[8,32], index: 0, kind: input, shape index: {}]   ;;  %s840_s1 = inlined_call_operand.vmem [shape: bf16[32,260], index: 1, kind: input, shape index: {}]   ;;  %s841_s2 = inlined_call_operand.vmem [shape: f32[1,4], index: 2, kind: input, shape index: {}]   ;;  %s842_s3 = inlined_call_operand.vmem [shape: bf16[256,32], index: 3, kind: input, shape index: {}]   ;;  %s843_s4 = inlined_call_operand.vmem [shape: f32[1,32], index: 4, kind: input, shape index: {}]   ;;  %s844_s5 = inlined_call_operand.hbm [shape: f32[8,8], index: 5, kind: output, shape index: {}]  }
   0x1   :  { %v643_v0 = vld [vmem:[%s840_s1 + $0x4] ss:$12 sps:$4 sm:$0xff]   ;;  %v645_v1 = vld [vmem:[%s840_s1] ss:$12 sps:$4 sm:$0xff]   ;;  %100 = vmatprep.mubr.bf16.mxu1 %v699_v2  ;;  %v646_v3 = vld [vmem:[%s840_s1 + $0x1c] ss:$12 sps:$4 sm:$0xff]  }
   0x2   :  { %68 = vmatprep.subr.bf16.mxu1 %v643_v0  ;;  %v648_v4 = vld [vmem:[%s840_s1 + $0x18] ss:$12 sps:$4 sm:$0xff]   ;;  %v649_v6 = vld [vmem:[%s840_s1 + $0x8] ss:$12 sps:$4 sm:$0xff]   ;;  %v650_v9 = vld [vmem:[%s840_s1 + $0x20] ss:$12 sps:$4 sm:$0xff]  }
   0x3   :  { %69 = vmatpush1.bf16.msra.mxu1 %v645_v1  ;;  %v22_v5 = vld [vmem:[%s839_s0] sm:$0xff] }
   0x4   :  { %70 = vmatprep.subr.bf16.mxu1 %v646_v3  ;;  %v23_v7 = vpack.c.bf16 %v22_v5, %v22_v5 }
   0x7   :  { %71 = vmatpush1.bf16.msra.mxu1 %v648_v4 }
   0x8   :  { %616 = vmatprep.subr.bf16.mxu1 %v700_v8 }
   0xa   :  { %560 = vmatmul.mubr.msk.bf16.vlgmr.msra.gmra.mrb[0].mxu1 %vm64_vm0, %v23_v7 }
   0xb   :  { %617 = vmatpush3.bf16.msra.mxu1 %v649_v6  ;;  %620 = vmatprep.mubr.msk.bf16.mxu1 %vm701_vm1, %v700_v8 }
   0xc   :  { %618 = vmatprep.subr.bf16.mxu1 %v700_v8 }
   0xf   :  { %619 = vmatpush3.bf16.msra.mxu1 %v650_v9 }
  0x10   :  { %10 = vsyncpa [#allocation3], 0  ;;  %624 = vmatprep.subr.bf16.mxu1 %v700_v8  ;;  %v651_v10 = vld [vmem:[%s842_s3 + $0x40] sm:$0xff]   ;;  %v653_v12 = vld [vmem:[%s842_s3 + $0x48] sm:$0xff]   ;;  %vm157_vm2 = vcmask 31744   ;;  %vm408_vm6 = vcmask 1041408  }
  0x11   :  { %v652_v11 = vld [vmem:[%s842_s3] sm:$0xff]   ;;  %589 = vmatprep.subr.bf16.mxu0 %v651_v10  ;;  %v654_v13 = vld [vmem:[%s842_s3 + $0x8] sm:$0xff]   ;;  %v655_v14 = vld [vmem:[%s842_s3 + $0x50] sm:$0xff]   ;;  %s703_s12 = smov [#allocation2]  }
  0x12   :  { %621 = vmatmul.mubr.msk.bf16.vlgmr.msra.gmra.mrb[4].mxu1 %vm64_vm0, %v23_v7  ;;  %590 = vmatpush3.bf16.msra.mxu0 %v652_v11  ;;  %v656_v15 = vld [vmem:[%s842_s3 + $0x10] sm:$0xff]   ;;  %v657_v16 = vld [vmem:[%s842_s3 + $0x58] sm:$0xff]   ;;  %v659_v18 = vld [vmem:[%s842_s3 + $0x60] sm:$0xff]   ;;  %s546_s13 = sshll.u32 %s703_s12, 4  ;;  %s547_s13 = int_to_ptr.vmem [resolvable:$true] %s546_s13 }
  0x13   :  { %626 = vmatprep.mubr.msk.bf16.mxu1 %vm701_vm1, %v700_v8  ;;  %591 = vmatprep.subr.bf16.mxu0 %v653_v12  ;;  %v658_v17 = vld [vmem:[%s842_s3 + $0x18] sm:$0xff]   ;;  %v660_v19 = vld [vmem:[%s842_s3 + $0x20] sm:$0xff]   ;;  %v661_v20 = vld [vmem:[%s842_s3 + $0x68] sm:$0xff]   ;;  %s675_s14 = scalar_lea.vmem %s547_s13, 128  ;;  %p680_p1 = scmp.lt.s32.totalorder %s547_s13, %s547_s13 }
  0x14   :  { %v662_v21 = vld [vmem:[%s842_s3 + $0x28] sm:$0xff]   ;;  %v663_v22 = vld [vmem:[%s842_s3 + $0x70] sm:$0xff]   ;;  %v665_v24 = vld [vmem:[%s842_s3 + $0x78] sm:$0xff]   ;;  %p676_p0 = scmp.ne.s32.totalorder %s547_s13, %s675_s14  ;;  %p681_p2 = scmp.lt.s32.totalorder %s675_s14, %s675_s14 }
  0x15   :  { %v664_v23 = vld [vmem:[%s842_s3 + $0x30] sm:$0xff]   ;;  %v666_v25 = vld [vmem:[%s842_s3 + $0x38] sm:$0xff]   ;;  %v562_v42 = vld [vmem:[%s841_s2] ss:$0 sm:$0xff] }
  0x16   :  { %592 = vmatpush3.bf16.msra.mxu0 %v654_v13  ;;  %p682_p3 = por %p681_p2, %p680_p1 }
  0x17   :  { %593 = vmatprep.subr.bf16.mxu0 %v655_v14 }
  0x18   :  { %p683_p4 = pnand %p682_p3, %p676_p0 }
  0x1a   :  { %594 = vmatpush3.bf16.msra.mxu0 %v656_v15 }
  0x1b   :  { %595 = vmatprep.subr.bf16.mxu0 %v657_v16 }
  0x1e   :  { %596 = vmatpush3.bf16.msra.mxu0 %v658_v17 }
  0x1f   :  { %597 = vmatprep.subr.bf16.mxu0 %v659_v18 }
  0x22   :  { %598 = vmatpush3.bf16.msra.mxu0 %v660_v19 }
  0x23   :  { %599 = vmatprep.subr.bf16.mxu0 %v661_v20 }
  0x26   :  { %600 = vmatpush3.bf16.msra.mxu0 %v662_v21 }
  0x27   :  { %601 = vmatprep.subr.bf16.mxu0 %v663_v22 }
  0x2a   :  { %602 = vmatpush3.bf16.msra.mxu0 %v664_v23 }
  0x2b   :  { %603 = vmatprep.subr.bf16.mxu0 %v665_v24 }
  0x2e   :  { %604 = vmatpush3.bf16.msra.mxu0 %v666_v25  ;;  %v392_v25 = vlaneseq }
  0xdd   :  { %v102_v26 = vpop.f32.mrb[0].mxu1 }
  0xde   :  { %v169_v27 = vrot.slane %v102_v26, 4  ;;  %v184_v28 = vmul.f32 %v102_v26, %v102_v26  ;;  %v104_v29 = vpop.f32.mrb[1].mxu1 }
  0xdf   :  { %v175_v30 = vrot.slane %v104_v29, 4  ;;  %v185_v31 = vmul.f32 %v104_v29, %v104_v29  ;;  %v106_v32 = vpop.f32.mrb[2].mxu1 }
  0xe0   :  { %v170_v33 = vadd.f32 %v169_v27, %v102_v26  ;;  %v186_v34 = vrot.slane %v184_v28, 4  ;;  %v107_v35 = vpop.f32.mrb[3].mxu1 }
  0xe1   :  { %v176_v36 = vadd.f32 %v175_v30, %v104_v29  ;;  %v192_v37 = vrot.slane %v185_v31, 4 }
  0xe2   :  { %v171_v38 = vrot.slane %v170_v33, 2  ;;  %v187_v39 = vadd.f32 %v186_v34, %v184_v28  ;;  %v395_v28 = vand.u32 127, %v392_v25 }
  0xe3   :  { %v177_v40 = vrot.slane %v176_v36, 2  ;;  %v193_v41 = vadd.f32 %v192_v37, %v185_v31 }
  0xe4   :  { %v172_v43 = vadd.f32 %v171_v38, %v170_v33  ;;  %v188_v44 = vrot.slane %v187_v39, 2 }
  0xe5   :  { %v194_v45 = vrot.slane %v193_v41, 2  ;;  %v143_v46 = vpop.f32.mrb[4].mxu1  ;;  %v178_v47 = vadd.f32 %v177_v40, %v176_v36 }
  0xe6   :  { %v173_v48 = vrot.slane %v172_v43, 1  ;;  %v189_v49 = vadd.f32 %v188_v44, %v187_v39  ;;  %v156_v50 = vadd.f32 %v562_v42, %v143_v46  ;;  %v622_v51 = vpop.f32.mrb[5].mxu1  ;;  %v702_v46 = vmov 1.0|1.0  }
  0xe7   :  { %v195_v52 = vadd.f32 %v194_v45, %v193_v41  ;;  %v146_v53 = vpop.f32.mrb[6].mxu1  ;;  %v179_v54 = vrot.slane %v178_v47, 1 }
  0xe8   :  { %v174_v55 = vadd.f32 %v173_v48, %v172_v43  ;;  %v190_v56 = vrot.slane %v189_v49, 1  ;;  %v623_v57 = vpop.f32.mrb[7].mxu1  ;;  %v158_v58 = vsel %vm157_vm2, %v156_v50, -inf }
  0xe9   :  { %v196_v59 = vrot.slane %v195_v52, 1  ;;  %159 = vmax.xlane.f32.xlu0 %v158_v58  ;;  %v180_v60 = vadd.f32 %v179_v54, %v178_v47 }
  0xea   :  { %v182_v61 = vmul.f32 0.125, %v174_v55  ;;  %v191_v62 = vadd.f32 %v190_v56, %v189_v49 }
  0xeb   :  { %v183_v63 = vmul.f32 0.125, %v180_v60  ;;  %v197_v0 = vadd.f32 %v196_v59, %v195_v52 }
  0xec   :  { %v198_v1 = vmul.f32 0.125, %v191_v62  ;;  %v200_v2 = vmul.f32 %v182_v61, %v182_v61  ;;  %v204_v10 = vsub.f32 %v102_v26, %v182_v61  ;;  %v393_v26 = vshrl.u32 %v392_v25, 7 }
  0xed   :  { %v199_v3 = vmul.f32 0.125, %v197_v0  ;;  %v201_v4 = vmul.f32 %v183_v63, %v183_v63  ;;  %v205_v12 = vsub.f32 %v104_v29, %v183_v63 }
  0xee   :  { %v202_v5 = vsub.f32 %v198_v1, %v200_v2  ;;  %v398_v27 = vadd.s32 1, %v393_v26  ;;  %v396_v29 = vmul.u32 8, %v393_v26  ;;  %v452_v40 = vadd.s32 8, %v393_v26 }
  0xef   :  { %v203_v6 = vsub.f32 %v199_v3, %v201_v4  ;;  %v455_v42 = vsub.s32 %v393_v26, %v395_v28  ;;  %v454_v47 = vadd.s32 24, %v393_v26  ;;  %v453_v48 = vadd.s32 16, %v393_v26 }
  0xf0   :  { %v206_v7 = vadd.f32 1e-05, %v202_v5  ;;  %v399_v30 = vmul.u32 8, %v398_v27  ;;  %vm397_vm3 = vcmp.ge.s32.totalorder %v395_v28, %v396_v29  ;;  %v456_v41 = vsub.s32 %v452_v40, %v395_v28 }
  0xf1   :  { %v207_v9 = vadd.f32 1e-05, %v203_v6  ;;  %vm459_vm9 = vcmp.eq.s32.totalorder %v455_v42, 0  ;;  %v458_v49 = vsub.s32 %v454_v47, %v395_v28 }
  0xf2   :  { %667 = vrsqrt.f32 %v206_v7  ;;  %vm400_vm4 = vcmp.lt.s32.totalorder %v395_v28, %v399_v30  ;;  %vm460_vm7 = vcmp.eq.s32.totalorder %v456_v41, 0  ;;  %vm464_vm8 = vcmp.eq.s32.totalorder %v456_v41, 8 }
  0xf3   :  { %669 = vrsqrt.f32 %v207_v9  ;;  %vm401_vm5 = vmand %vm397_vm3, %vm400_vm4  ;;  %vm462_vm12 = vcmp.eq.s32.totalorder %v458_v49, 0  ;;  %vm466_vm13 = vcmp.eq.s32.totalorder %v458_v49, 8  ;;  %vm474_vm4 = vcmp.eq.s32.totalorder %v458_v49, 16 }
  0xf4   :  { %v402_v31 = vsel %vm401_vm5, 1.0, %v700_v8  ;;  %vm468_vm10 = vmor %vm460_vm7, %vm464_vm8 }
  0xf5   :  { %v403_v32 = vpack.c.bf16 %v402_v31, %v402_v31  ;;  %vm581_vm11 = vmpackc.low %vm468_vm10, %vm459_vm9 }
  0xf6   :  { %vm470_vm3 = vmor %vm462_vm12, %vm466_vm13 }
  0xf7   :  { %v410_v33 = vsel %vm408_vm6, %v403_v32, 0  ;;  %vm478_vm8 = vmor %vm470_vm3, %vm474_vm4 }
  0xf8   :  { %625 = vmatpush3.bf16.msra.mxu1 %v410_v33 }
  0xf9   :  { %630 = vmatprep.subr.bf16.mxu1 %v700_v8 }
  0xfc   :  { %v668_v11 = vpop.eup %667 }
  0xfd   :  { %v670_v13 = vpop.eup %669  ;;  %v210_v14 = vmul.f32 %v668_v11, %v204_v10 }
  0xfe   :  { %v211_v15 = vmul.f32 %v670_v13, %v205_v12 }
  0xff   :  { %v212_v16 = vmax.f32 %v210_v14, 0.0 }
 0x100   :  { %v213_v17 = vmax.f32 %v211_v15, 0.0 }
 0x101   :  { %v214_v19 = vpack.c.bf16 %v212_v16, %v212_v16 }
 0x102   :  { %v215_v18 = vpack.c.bf16 %v213_v17, %v213_v17 }
 0x104   :  { %383 = vmatprep.mubr.bf16.mxu0 %v215_v18 }
 0x105   :  { %384 = vmatmul.mubr.bf16.vlgmr.msra.gmra.mrb[0].mxu0 %v214_v19 }
 0x176   :  { %v160_v20 = vpop.xlane.xlu0 %159 }
 0x177   :  { %v161_v21 = vsub.f32 %v156_v50, %v160_v20  ;;  %v457_v50 = vsub.s32 %v453_v48, %v395_v28 }
 0x179   :  { %v162_v22 = vmul.f32 1.442695, %v161_v21  ;;  %vm461_vm14 = vcmp.eq.s32.totalorder %v457_v50, 0  ;;  %vm465_vm15 = vcmp.eq.s32.totalorder %v457_v50, 8  ;;  %vm473_vm6 = vcmp.eq.s32.totalorder %v457_v50, 16 }
 0x17a   :  { %vm469_vm5 = vmor %vm461_vm14, %vm465_vm15 }
 0x17b   :  { %671 = vpow2.f32 %v162_v22  ;;  %vm477_vm7 = vmor %vm469_vm5, %vm473_vm6 }
 0x185   :  { %v672_v23 = vpop.eup %671 }
 0x186   :  { %v164_v24 = vsel %vm157_vm2, %v672_v23, 0.0 }
 0x187   :  { %165 = vadd.xlane.f32.xlu0 %v164_v24 }
 0x1d8   :  { %v605_v34 = vpop.f32.mrb[0].mxu0 }
 0x1d9   :  { %v606_v35 = vpop.f32.mrb[1].mxu0 }
 0x1da   :  { %v607_v36 = vadd.f32 %v606_v35, %v605_v34  ;;  %v608_v37 = vpop.f32.mrb[2].mxu0 }
 0x1db   :  { %v609_v38 = vpop.f32.mrb[3].mxu0 }
 0x214   :  { %v166_v39 = vpop.xlane.xlu0 %165 }
 0x215   :  { %673 = vrcp.f32 %v166_v39 }
 0x21f   :  { %v674_v43 = vpop.eup %673 }
 0x220   :  { %v168_v44 = vmul.f32 %v674_v43, %v672_v23 }
 0x222   :  { %v404_v45 = vpack.c.bf16 %v168_v44, %v168_v44 }
 0x224   :  { %627 = vmatmul.mubr.msk.bf16.vlgmr.msra.gmra.mrb[8].mxu1 %vm157_vm2, %v404_v45  ;;  %vm482_vm2 = vcmp.eq.s32.totalorder %v458_v49, 24 }
 0x225   :  { %631 = vmatpush3.bf16.msk.msra.mxu1 %vm581_vm11, %v702_v46  ;;  %634 = vmatprep.mubr.msk.bf16.mxu1 %vm701_vm1, %v700_v8  ;;  %vm486_vm9 = vmor %vm478_vm8, %vm482_vm2  ;;  %vm538_vm1 = vcmask 64512  }
 0x226   :  { %632 = vmatprep.subr.bf16.mxu1 %v700_v8  ;;  %vm583_vm10 = vmpackc.low %vm486_vm9, %vm477_vm7  ;;  %v563_v8 = vld [vmem:[%s843_s4] ss:$0 sm:$0xff] }
 0x227   :  { %v386_v51 = vadd.f32 %v607_v36, %v563_v8 }
 0x229   :  { %633 = vmatpush3.bf16.msk.msra.mxu1 %vm583_vm10, %v702_v46  ;;  %v391_v52 = vmax.f32 %v386_v51, 0.0 }
 0x2f7   :  { %v446_v53 = vpop.f32.mrb[8].mxu1 }
 0x2f8   :  { %v493_v54 = vmul.f32 %v446_v53, %v391_v52  ;;  %v628_v55 = vpop.f32.mrb[9].mxu1 }
 0x2f9   :  { %v449_v56 = vpop.f32.mrb[10].mxu1 }
 0x2fa   :  { %v494_v57 = vpack.c.bf16 %v493_v54, %v493_v54  ;;  %v629_v58 = vpop.f32.mrb[11].mxu1 }
 0x2fc   :  { %635 = vmatmul.mubr.msk.bf16.vlgmr.msra.gmra.mrb[12].mxu1 %vm64_vm0, %v494_v57 }
 0x3cf   :  { %v532_v59 = vpop.f32.mrb[12].mxu1 }
 0x3d0   :  { %539 = vst.msk [vmem:[#allocation2] sm:$0xff] %vm538_vm1, %v532_v59  ;;  %v636_v60 = vpop.f32.mrb[13].mxu1 }
 0x3d1   :  { %v535_v61 = vpop.f32.mrb[14].mxu1 }
 0x3d2   :  { %686 = shalt.err (!%p683_p4)
}
 0x3d3   :  { %s687_s16 = scalar_lea.hbm %s844_s5, 128 }
 0x3d4   :  { %p688_p5 = scmp.ne.s32.totalorder %s844_s5, %s687_s16  ;;  %p691_p6 = scmp.lt.u32.totalorder %s687_s16, %s844_s5 }
 0x3d6   :  { %p693_p7 = pnand %p691_p6, %p688_p5 }
 0x3d8   :  { %696 = shalt.err (!%p693_p7)
}
 0x3d9   :  { %549 = dma.vmem_to_hbm [thread:$0]  %s547_s13, 128, %s844_s5, [#allocation3]   ;;  %v637_v62 = vpop.f32.mrb[15].mxu1 }
 0x3da   :  { %697 = dma.done.wait [#allocation3], 128  }
 0x3db   :  { %698 = vsyncadd [#allocation3], 4294967168 }
 0x3dc   :  { %553 = vsyncpa [#allocation3], 1 }

</bundles_post_ra>
